<compile_context>
chip_gen: v5e
topology: v5e:2x2
jax: 0.10.0
libtpu: 0.0.40
codegen_flags: <defaults>
</compile_context>

<pallas_src>
import functools

import jax
import jax.numpy as jnp
from jax.experimental import pallas as pl
from jax.experimental.pallas import tpu as pltpu


# ----------------------------------------------------------------------------
# Glue: Rodrigues / so3 exponential map (pytorch3d-style), tiny (heads x 3).
# ----------------------------------------------------------------------------
def _hat(v):
    # v: (H, 3) -> skew-symmetric (H, 3, 3)
    x, y, z = v[:, 0], v[:, 1], v[:, 2]
    zero = jnp.zeros_like(x)
    row0 = jnp.stack([zero, -z, y], axis=-1)
    row1 = jnp.stack([z, zero, -x], axis=-1)
    row2 = jnp.stack([-y, x, zero], axis=-1)
    return jnp.stack([row0, row1, row2], axis=-2)


def so3_exponential_map(log_rot, eps=1e-4):
    # log_rot: (H, 3) -> (H, 3, 3) rotation matrices
    nrms = jnp.sum(log_rot * log_rot, axis=-1)
    rot_angles = jnp.sqrt(jnp.maximum(nrms, eps))
    inv_angles = 1.0 / rot_angles
    fac1 = inv_angles * jnp.sin(rot_angles)
    fac2 = inv_angles * inv_angles * (1.0 - jnp.cos(rot_angles))
    skews = _hat(log_rot)
    skews_sq = jnp.matmul(skews, skews)
    eye = jnp.eye(3, dtype=log_rot.dtype)[None]
    return fac1[:, None, None] * skews + fac2[:, None, None] * skews_sq + eye


# ----------------------------------------------------------------------------
# Pallas kernel: one (bh-row-group, chunk-tile) block per grid step.
#   coef  : (H*8,) flat table in SMEM
#           per head: [r00*s0, r10*s0, r20*s0, r01*s1, r11*s1, r21*s1, b0, b1]
#   pcd   : (TBH, 3, TQ, 128) block in VMEM  -> dense (TQ,128) slabs per row
#   out   : (TBH, 2, TQ, 128) block in VMEM  -> dense, unmasked stores
# The row loop is a static Python unroll (TBH <= 64).
# ----------------------------------------------------------------------------
def _plane_kernel(num_heads, tbh, heads_aligned, coef_ref, pcd_ref, out_ref):
    bh0 = pl.program_id(0) * tbh
    for r in range(tbh):
        if heads_aligned:
            # TBH is a multiple of H -> head index is static per unrolled row.
            base = (r % num_heads) * 8
        else:
            base = ((bh0 + r) % num_heads) * 8  # dynamic SMEM index

        x0 = pcd_ref[r, 0]
        x1 = pcd_ref[r, 1]
        x2 = pcd_ref[r, 2]

        out_ref[r, 0] = (x0 * coef_ref[base + 0] + x1 * coef_ref[base + 1]
                         + x2 * coef_ref[base + 2] + coef_ref[base + 6])
        out_ref[r, 1] = (x0 * coef_ref[base + 3] + x1 * coef_ref[base + 4]
                         + x2 * coef_ref[base + 5] + coef_ref[base + 7])


def _largest_divisor_le(n, limit):
    """Largest divisor of n that is <= limit (>= 1)."""
    limit = max(1, min(n, limit))
    for d in range(limit, 0, -1):
        if n % d == 0:
            return d
    return 1


def plane_transformer(pcd, log_R, shift, scales=None, *,
                      target_chunks=1024, max_rows_per_step=64):
    """Forward pass of PlaneTransformer.

    pcd    : (B, H, 3, P) float32
    log_R  : (H, 3) float32
    shift  : (H, 3) float32
    scales : (H, 2) float32 or None
    returns: (B, H, 2, P) float32
    """
    B, H, C, P = pcd.shape
    assert C == 3, "PlaneTransformer expects 3 coordinate channels"

    # Pad the point dimension to a multiple of 128 lanes (sliced off at the end).
    Pp = ((P + 127) // 128) * 128
    pcd_p = pcd if Pp == P else jnp.pad(pcd, ((0, 0), (0, 0), (0, 0), (0, Pp - P)))
    Q = Pp // 128

    # Fold rotation + shift + scales into one affine per head (JAX glue),
    # flattened to 1-D for a compact SMEM layout.
    R = so3_exponential_map(log_R)                           # (H, 3, 3), R[h,c,n]
    scales_eff = (jnp.ones((H, 2), dtype=pcd.dtype)
                  if scales is None else scales)
    R2 = R[:, :, :2] * scales_eff[:, None, :]                # (H, 3, 2)
    bias = jnp.einsum("hc,hcn->hn", shift, R[:, :, :2]) * scales_eff  # (H, 2)
    coef = jnp.concatenate(
        [R2[:, :, 0], R2[:, :, 1], bias], axis=-1)           # (H, 8)
    coef = coef.reshape(H * 8).astype(jnp.float32)           # flat 1-D SMEM table

    BH = B * H

    # --- tile selection ------------------------------------------------------
    if Q <= target_chunks:
        # Whole row per step (contiguous DMA); pack multiple bh rows.
        TQ = Q
        cap = min(max_rows_per_step, max(1, target_chunks // max(Q, 1)))
        if H <= cap:
            TBH = H * _largest_divisor_le(B, cap // H)        # multiple of H
        else:
            TBH = _largest_divisor_le(H, cap)                 # divides H
        num_q = 1
    else:
        # Huge rows: one bh row per step, chunk the point axis; cap the block
        # so double-buffered VMEM stays ~5 MiB even for poorly-factorable Q.
        TQ = max(8, (target_chunks // 8) * 8)
        TBH = 1
        num_q = pl.cdiv(Q, TQ)                                # ragged tail OK

    heads_aligned = (TBH % H == 0)
    grid = (BH // TBH, num_q)                                 # bh axis leads

    # Sublane-dense view of the point axis and a flat batch*head axis.
    x = pcd_p.reshape(BH, 3, Q, 128)

    out = pl.pallas_call(
        functools.partial(_plane_kernel, H, TBH, heads_aligned),
        grid=grid,
        in_specs=[
            pl.BlockSpec(memory_space=pltpu.MemorySpace.SMEM),     # coef table
            pl.BlockSpec((TBH, 3, TQ, 128), lambda bh, q: (bh, 0, q, 0)),
        ],
        out_specs=pl.BlockSpec((TBH, 2, TQ, 128), lambda bh, q: (bh, 0, q, 0)),
        out_shape=jax.ShapeDtypeStruct((BH, 2, Q, 128), pcd.dtype),
        compiler_params=pltpu.CompilerParams(
            dimension_semantics=("parallel", "parallel")),
        cost_estimate=pl.CostEstimate(
            flops=12 * BH * Pp,
            transcendentals=0,
            bytes_accessed=BH * (3 + 2) * Pp * 4),
    )(coef, x)

    out = out.reshape(B, H, 2, Pp)
    if Pp != P:
        out = out[..., :P]
    return out


# ----------------------------------------------------------------------------
# Pure-JAX reference (mirrors the PyTorch forward exactly).
# ----------------------------------------------------------------------------
def plane_transformer_ref(pcd, log_R, shift, scales=None):
    R = so3_exponential_map(log_R)
    x = pcd + shift[None, :, :, None]
    y = jnp.einsum("bhcp,hcn->bhnp", x, R)
    y = y[:, :, :2]
    if scales is not None:
        y = y * scales[None, :, :, None]
    return y


if __name__ == "__main__":
    B, H, P = 2, 4, 256

    key = jax.random.PRNGKey(0)
    k_pcd, k_logR, k_shift, k_scales = jax.random.split(key, 4)

    pcd = jax.random.normal(k_pcd, (B, H, 3, P), dtype=jnp.float32)
    # Module __init__ shapes: log_R (H,3) randn, shift (H,3), scales (H,2).
    # shift/scales get non-trivial values so the folded affine is exercised.
    log_R = jax.random.normal(k_logR, (H, 3), dtype=jnp.float32)
    shift = jax.random.normal(k_shift, (H, 3), dtype=jnp.float32)
    scales = 1.0 + 0.1 * jax.random.normal(k_scales, (H, 2), dtype=jnp.float32)

    # do_scales = True path
    out_scaled = jax.block_until_ready(plane_transformer(pcd, log_R, shift, scales))
    ref_scaled = plane_transformer_ref(pcd, log_R, shift, scales)
    assert out_scaled.shape == (B, H, 2, P)
    assert jnp.allclose(out_scaled, ref_scaled, atol=2e-5, rtol=2e-5), (
        "mismatch (scales=True)"
    )

    # do_scales = False path
    out_plain = jax.block_until_ready(plane_transformer(pcd, log_R, shift, None))
    ref_plain = plane_transformer_ref(pcd, log_R, shift, None)
    assert jnp.allclose(out_plain, ref_plain, atol=2e-5, rtol=2e-5), (
        "mismatch (scales=False)"
    )

    # Non-multiple-of-128 point count (exercises the padding path).
    P2 = 200
    pcd2 = jax.random.normal(jax.random.PRNGKey(1), (B, H, 3, P2), dtype=jnp.float32)
    out_pad = jax.block_until_ready(plane_transformer(pcd2, log_R, shift, scales))
    ref_pad = plane_transformer_ref(pcd2, log_R, shift, scales)
    assert out_pad.shape == (B, H, 2, P2)
    assert jnp.allclose(out_pad, ref_pad, atol=2e-5, rtol=2e-5), (
        "mismatch (padded P)"
    )

    print("KERNEL_OK")
</pallas_src>

<mosaic_0001>
module attributes {stable_mosaic.version = 11 : i64} {
  func.func @_plane_kernel(%arg0: i32, %arg1: i32, %arg2: memref<32xf32, #tpu.memory_space<smem>>, %arg3: memref<8x3x2x128xf32, #tpu.memory_space<vmem>>, %arg4: memref<8x2x2x128xf32, #tpu.memory_space<vmem>>) attributes {dimension_semantics = [#tpu.dimension_semantics<parallel>, #tpu.dimension_semantics<parallel>], iteration_bounds = array<i64: 1, 1>, scalar_prefetch = 0 : i64, scratch_operands = 0 : i64, tpu.core_type = #tpu.core_type<tc>, window_params = [{transform_indices = @transform_0, window_bounds = array<i64: 32>}, {transform_indices = @transform_1, window_bounds = array<i64: 8, 3, 2, 128>}, {transform_indices = @transform_2, window_bounds = array<i64: 8, 2, 2, 128>}]} {
    %c0 = arith.constant 0 : index
    %c0_0 = arith.constant 0 : index
    %c0_1 = arith.constant 0 : index
    %c0_2 = arith.constant 0 : index
    %0 = vector.load %arg3[%c0, %c0_0, %c0_1, %c0_2] : memref<8x3x2x128xf32, #tpu.memory_space<vmem>>, vector<1x1x2x128xf32>
    %1 = vector.shape_cast %0 : vector<1x1x2x128xf32> to vector<2x128xf32>
    %c0_3 = arith.constant 0 : index
    %c1 = arith.constant 1 : index
    %c0_4 = arith.constant 0 : index
    %c0_5 = arith.constant 0 : index
    %2 = vector.load %arg3[%c0_3, %c1, %c0_4, %c0_5] : memref<8x3x2x128xf32, #tpu.memory_space<vmem>>, vector<1x1x2x128xf32>
    %3 = vector.shape_cast %2 : vector<1x1x2x128xf32> to vector<2x128xf32>
    %c0_6 = arith.constant 0 : index
    %c2 = arith.constant 2 : index
    %c0_7 = arith.constant 0 : index
    %c0_8 = arith.constant 0 : index
    %4 = vector.load %arg3[%c0_6, %c2, %c0_7, %c0_8] : memref<8x3x2x128xf32, #tpu.memory_space<vmem>>, vector<1x1x2x128xf32>
    %5 = vector.shape_cast %4 : vector<1x1x2x128xf32> to vector<2x128xf32>
    %c0_9 = arith.constant 0 : index
    %6 = memref.load %arg2[%c0_9] : memref<32xf32, #tpu.memory_space<smem>>
    %7 = vector.broadcast %6 : f32 to vector<2x128xf32>
    %8 = arith.mulf %1, %7 : vector<2x128xf32>
    %c1_10 = arith.constant 1 : index
    %9 = memref.load %arg2[%c1_10] : memref<32xf32, #tpu.memory_space<smem>>
    %10 = vector.broadcast %9 : f32 to vector<2x128xf32>
    %11 = arith.mulf %3, %10 : vector<2x128xf32>
    %12 = arith.addf %8, %11 : vector<2x128xf32>
    %c2_11 = arith.constant 2 : index
    %13 = memref.load %arg2[%c2_11] : memref<32xf32, #tpu.memory_space<smem>>
    %14 = vector.broadcast %13 : f32 to vector<2x128xf32>
    %15 = arith.mulf %5, %14 : vector<2x128xf32>
    %16 = arith.addf %12, %15 : vector<2x128xf32>
    %c6 = arith.constant 6 : index
    %17 = memref.load %arg2[%c6] : memref<32xf32, #tpu.memory_space<smem>>
    %18 = vector.broadcast %17 : f32 to vector<2x128xf32>
    %19 = arith.addf %16, %18 : vector<2x128xf32>
    %c0_12 = arith.constant 0 : index
    %c0_13 = arith.constant 0 : index
    %c0_14 = arith.constant 0 : index
    %c0_15 = arith.constant 0 : index
    %20 = vector.load %arg4[%c0_12, %c0_13, %c0_14, %c0_15] : memref<8x2x2x128xf32, #tpu.memory_space<vmem>>, vector<1x1x2x128xf32>
    %21 = vector.shape_cast %20 : vector<1x1x2x128xf32> to vector<2x128xf32>
    %22 = vector.shape_cast %19 : vector<2x128xf32> to vector<1x1x2x128xf32>
    tpu.vector_store %arg4[%c0_12, %c0_13, %c0_14, %c0_15], %22 {strides = array<i32>} : memref<8x2x2x128xf32, #tpu.memory_space<vmem>>, vector<1x1x2x128xf32>,
    %c3 = arith.constant 3 : index
    %23 = memref.load %arg2[%c3] : memref<32xf32, #tpu.memory_space<smem>>
    %24 = vector.broadcast %23 : f32 to vector<2x128xf32>
    %25 = arith.mulf %1, %24 : vector<2x128xf32>
    %c4 = arith.constant 4 : index
    %26 = memref.load %arg2[%c4] : memref<32xf32, #tpu.memory_space<smem>>
    %27 = vector.broadcast %26 : f32 to vector<2x128xf32>
    %28 = arith.mulf %3, %27 : vector<2x128xf32>
    %29 = arith.addf %25, %28 : vector<2x128xf32>
    %c5 = arith.constant 5 : index
    %30 = memref.load %arg2[%c5] : memref<32xf32, #tpu.memory_space<smem>>
    %31 = vector.broadcast %30 : f32 to vector<2x128xf32>
    %32 = arith.mulf %5, %31 : vector<2x128xf32>
    %33 = arith.addf %29, %32 : vector<2x128xf32>
    %c7 = arith.constant 7 : index
    %34 = memref.load %arg2[%c7] : memref<32xf32, #tpu.memory_space<smem>>
    %35 = vector.broadcast %34 : f32 to vector<2x128xf32>
    %36 = arith.addf %33, %35 : vector<2x128xf32>
    %c0_16 = arith.constant 0 : index
    %c1_17 = arith.constant 1 : index
    %c0_18 = arith.constant 0 : index
    %c0_19 = arith.constant 0 : index
    %37 = vector.load %arg4[%c0_16, %c1_17, %c0_18, %c0_19] : memref<8x2x2x128xf32, #tpu.memory_space<vmem>>, vector<1x1x2x128xf32>
    %38 = vector.shape_cast %37 : vector<1x1x2x128xf32> to vector<2x128xf32>
    %39 = vector.shape_cast %36 : vector<2x128xf32> to vector<1x1x2x128xf32>
    tpu.vector_store %arg4[%c0_16, %c1_17, %c0_18, %c0_19], %39 {strides = array<i32>} : memref<8x2x2x128xf32, #tpu.memory_space<vmem>>, vector<1x1x2x128xf32>,
    %c1_20 = arith.constant 1 : index
    %c0_21 = arith.constant 0 : index
    %c0_22 = arith.constant 0 : index
    %c0_23 = arith.constant 0 : index
    %40 = vector.load %arg3[%c1_20, %c0_21, %c0_22, %c0_23] : memref<8x3x2x128xf32, #tpu.memory_space<vmem>>, vector<1x1x2x128xf32>
    %41 = vector.shape_cast %40 : vector<1x1x2x128xf32> to vector<2x128xf32>
    %c1_24 = arith.constant 1 : index
    %c1_25 = arith.constant 1 : index
    %c0_26 = arith.constant 0 : index
    %c0_27 = arith.constant 0 : index
    %42 = vector.load %arg3[%c1_24, %c1_25, %c0_26, %c0_27] : memref<8x3x2x128xf32, #tpu.memory_space<vmem>>, vector<1x1x2x128xf32>
    %43 = vector.shape_cast %42 : vector<1x1x2x128xf32> to vector<2x128xf32>
    %c1_28 = arith.constant 1 : index
    %c2_29 = arith.constant 2 : index
    %c0_30 = arith.constant 0 : index
    %c0_31 = arith.constant 0 : index
    %44 = vector.load %arg3[%c1_28, %c2_29, %c0_30, %c0_31] : memref<8x3x2x128xf32, #tpu.memory_space<vmem>>, vector<1x1x2x128xf32>
    %45 = vector.shape_cast %44 : vector<1x1x2x128xf32> to vector<2x128xf32>
    %c8 = arith.constant 8 : index
    %46 = memref.load %arg2[%c8] : memref<32xf32, #tpu.memory_space<smem>>
    %47 = vector.broadcast %46 : f32 to vector<2x128xf32>
    %48 = arith.mulf %41, %47 : vector<2x128xf32>
    %c9 = arith.constant 9 : index
    %49 = memref.load %arg2[%c9] : memref<32xf32, #tpu.memory_space<smem>>
    %50 = vector.broadcast %49 : f32 to vector<2x128xf32>
    %51 = arith.mulf %43, %50 : vector<2x128xf32>
    %52 = arith.addf %48, %51 : vector<2x128xf32>
    %c10 = arith.constant 10 : index
    %53 = memref.load %arg2[%c10] : memref<32xf32, #tpu.memory_space<smem>>
    %54 = vector.broadcast %53 : f32 to vector<2x128xf32>
    %55 = arith.mulf %45, %54 : vector<2x128xf32>
    %56 = arith.addf %52, %55 : vector<2x128xf32>
    %c14 = arith.constant 14 : index
    %57 = memref.load %arg2[%c14] : memref<32xf32, #tpu.memory_space<smem>>
    %58 = vector.broadcast %57 : f32 to vector<2x128xf32>
    %59 = arith.addf %56, %58 : vector<2x128xf32>
    %c1_32 = arith.constant 1 : index
    %c0_33 = arith.constant 0 : index
    %c0_34 = arith.constant 0 : index
    %c0_35 = arith.constant 0 : index
    %60 = vector.load %arg4[%c1_32, %c0_33, %c0_34, %c0_35] : memref<8x2x2x128xf32, #tpu.memory_space<vmem>>, vector<1x1x2x128xf32>
    %61 = vector.shape_cast %60 : vector<1x1x2x128xf32> to vector<2x128xf32>
    %62 = vector.shape_cast %59 : vector<2x128xf32> to vector<1x1x2x128xf32>
    tpu.vector_store %arg4[%c1_32, %c0_33, %c0_34, %c0_35], %62 {strides = array<i32>} : memref<8x2x2x128xf32, #tpu.memory_space<vmem>>, vector<1x1x2x128xf32>,
    %c11 = arith.constant 11 : index
    %63 = memref.load %arg2[%c11] : memref<32xf32, #tpu.memory_space<smem>>
    %64 = vector.broadcast %63 : f32 to vector<2x128xf32>
    %65 = arith.mulf %41, %64 : vector<2x128xf32>
    %c12 = arith.constant 12 : index
    %66 = memref.load %arg2[%c12] : memref<32xf32, #tpu.memory_space<smem>>
    %67 = vector.broadcast %66 : f32 to vector<2x128xf32>
    %68 = arith.mulf %43, %67 : vector<2x128xf32>
    %69 = arith.addf %65, %68 : vector<2x128xf32>
    %c13 = arith.constant 13 : index
    %70 = memref.load %arg2[%c13] : memref<32xf32, #tpu.memory_space<smem>>
    %71 = vector.broadcast %70 : f32 to vector<2x128xf32>
    %72 = arith.mulf %45, %71 : vector<2x128xf32>
    %73 = arith.addf %69, %72 : vector<2x128xf32>
    %c15 = arith.constant 15 : index
    %74 = memref.load %arg2[%c15] : memref<32xf32, #tpu.memory_space<smem>>
    %75 = vector.broadcast %74 : f32 to vector<2x128xf32>
    %76 = arith.addf %73, %75 : vector<2x128xf32>
    %c1_36 = arith.constant 1 : index
    %c1_37 = arith.constant 1 : index
    %c0_38 = arith.constant 0 : index
    %c0_39 = arith.constant 0 : index
    %77 = vector.load %arg4[%c1_36, %c1_37, %c0_38, %c0_39] : memref<8x2x2x128xf32, #tpu.memory_space<vmem>>, vector<1x1x2x128xf32>
    %78 = vector.shape_cast %77 : vector<1x1x2x128xf32> to vector<2x128xf32>
    %79 = vector.shape_cast %76 : vector<2x128xf32> to vector<1x1x2x128xf32>
    tpu.vector_store %arg4[%c1_36, %c1_37, %c0_38, %c0_39], %79 {strides = array<i32>} : memref<8x2x2x128xf32, #tpu.memory_space<vmem>>, vector<1x1x2x128xf32>,
    %c2_40 = arith.constant 2 : index
    %c0_41 = arith.constant 0 : index
    %c0_42 = arith.constant 0 : index
    %c0_43 = arith.constant 0 : index
    %80 = vector.load %arg3[%c2_40, %c0_41, %c0_42, %c0_43] : memref<8x3x2x128xf32, #tpu.memory_space<vmem>>, vector<1x1x2x128xf32>
    %81 = vector.shape_cast %80 : vector<1x1x2x128xf32> to vector<2x128xf32>
    %c2_44 = arith.constant 2 : index
    %c1_45 = arith.constant 1 : index
    %c0_46 = arith.constant 0 : index
    %c0_47 = arith.constant 0 : index
    %82 = vector.load %arg3[%c2_44, %c1_45, %c0_46, %c0_47] : memref<8x3x2x128xf32, #tpu.memory_space<vmem>>, vector<1x1x2x128xf32>
    %83 = vector.shape_cast %82 : vector<1x1x2x128xf32> to vector<2x128xf32>
    %c2_48 = arith.constant 2 : index
    %c2_49 = arith.constant 2 : index
    %c0_50 = arith.constant 0 : index
    %c0_51 = arith.constant 0 : index
    %84 = vector.load %arg3[%c2_48, %c2_49, %c0_50, %c0_51] : memref<8x3x2x128xf32, #tpu.memory_space<vmem>>, vector<1x1x2x128xf32>
    %85 = vector.shape_cast %84 : vector<1x1x2x128xf32> to vector<2x128xf32>
    %c16 = arith.constant 16 : index
    %86 = memref.load %arg2[%c16] : memref<32xf32, #tpu.memory_space<smem>>
    %87 = vector.broadcast %86 : f32 to vector<2x128xf32>
    %88 = arith.mulf %81, %87 : vector<2x128xf32>
    %c17 = arith.constant 17 : index
    %89 = memref.load %arg2[%c17] : memref<32xf32, #tpu.memory_space<smem>>
    %90 = vector.broadcast %89 : f32 to vector<2x128xf32>
    %91 = arith.mulf %83, %90 : vector<2x128xf32>
    %92 = arith.addf %88, %91 : vector<2x128xf32>
    %c18 = arith.constant 18 : index
    %93 = memref.load %arg2[%c18] : memref<32xf32, #tpu.memory_space<smem>>
    %94 = vector.broadcast %93 : f32 to vector<2x128xf32>
    %95 = arith.mulf %85, %94 : vector<2x128xf32>
    %96 = arith.addf %92, %95 : vector<2x128xf32>
    %c22 = arith.constant 22 : index
    %97 = memref.load %arg2[%c22] : memref<32xf32, #tpu.memory_space<smem>>
    %98 = vector.broadcast %97 : f32 to vector<2x128xf32>
    %99 = arith.addf %96, %98 : vector<2x128xf32>
    %c2_52 = arith.constant 2 : index
    %c0_53 = arith.constant 0 : index
    %c0_54 = arith.constant 0 : index
    %c0_55 = arith.constant 0 : index
    %100 = vector.load %arg4[%c2_52, %c0_53, %c0_54, %c0_55] : memref<8x2x2x128xf32, #tpu.memory_space<vmem>>, vector<1x1x2x128xf32>
    %101 = vector.shape_cast %100 : vector<1x1x2x128xf32> to vector<2x128xf32>
    %102 = vector.shape_cast %99 : vector<2x128xf32> to vector<1x1x2x128xf32>
    tpu.vector_store %arg4[%c2_52, %c0_53, %c0_54, %c0_55], %102 {strides = array<i32>} : memref<8x2x2x128xf32, #tpu.memory_space<vmem>>, vector<1x1x2x128xf32>,
    %c19 = arith.constant 19 : index
    %103 = memref.load %arg2[%c19] : memref<32xf32, #tpu.memory_space<smem>>
    %104 = vector.broadcast %103 : f32 to vector<2x128xf32>
    %105 = arith.mulf %81, %104 : vector<2x128xf32>
    %c20 = arith.constant 20 : index
    %106 = memref.load %arg2[%c20] : memref<32xf32, #tpu.memory_space<smem>>
    %107 = vector.broadcast %106 : f32 to vector<2x128xf32>
    %108 = arith.mulf %83, %107 : vector<2x128xf32>
    %109 = arith.addf %105, %108 : vector<2x128xf32>
    %c21 = arith.constant 21 : index
    %110 = memref.load %arg2[%c21] : memref<32xf32, #tpu.memory_space<smem>>
    %111 = vector.broadcast %110 : f32 to vector<2x128xf32>
    %112 = arith.mulf %85, %111 : vector<2x128xf32>
    %113 = arith.addf %109, %112 : vector<2x128xf32>
    %c23 = arith.constant 23 : index
    %114 = memref.load %arg2[%c23] : memref<32xf32, #tpu.memory_space<smem>>
    %115 = vector.broadcast %114 : f32 to vector<2x128xf32>
    %116 = arith.addf %113, %115 : vector<2x128xf32>
    %c2_56 = arith.constant 2 : index
    %c1_57 = arith.constant 1 : index
    %c0_58 = arith.constant 0 : index
    %c0_59 = arith.constant 0 : index
    %117 = vector.load %arg4[%c2_56, %c1_57, %c0_58, %c0_59] : memref<8x2x2x128xf32, #tpu.memory_space<vmem>>, vector<1x1x2x128xf32>
    %118 = vector.shape_cast %117 : vector<1x1x2x128xf32> to vector<2x128xf32>
    %119 = vector.shape_cast %116 : vector<2x128xf32> to vector<1x1x2x128xf32>
    tpu.vector_store %arg4[%c2_56, %c1_57, %c0_58, %c0_59], %119 {strides = array<i32>} : memref<8x2x2x128xf32, #tpu.memory_space<vmem>>, vector<1x1x2x128xf32>,
    %c3_60 = arith.constant 3 : index
    %c0_61 = arith.constant 0 : index
    %c0_62 = arith.constant 0 : index
    %c0_63 = arith.constant 0 : index
    %120 = vector.load %arg3[%c3_60, %c0_61, %c0_62, %c0_63] : memref<8x3x2x128xf32, #tpu.memory_space<vmem>>, vector<1x1x2x128xf32>
    %121 = vector.shape_cast %120 : vector<1x1x2x128xf32> to vector<2x128xf32>
    %c3_64 = arith.constant 3 : index
    %c1_65 = arith.constant 1 : index
    %c0_66 = arith.constant 0 : index
    %c0_67 = arith.constant 0 : index
    %122 = vector.load %arg3[%c3_64, %c1_65, %c0_66, %c0_67] : memref<8x3x2x128xf32, #tpu.memory_space<vmem>>, vector<1x1x2x128xf32>
    %123 = vector.shape_cast %122 : vector<1x1x2x128xf32> to vector<2x128xf32>
    %c3_68 = arith.constant 3 : index
    %c2_69 = arith.constant 2 : index
    %c0_70 = arith.constant 0 : index
    %c0_71 = arith.constant 0 : index
    %124 = vector.load %arg3[%c3_68, %c2_69, %c0_70, %c0_71] : memref<8x3x2x128xf32, #tpu.memory_space<vmem>>, vector<1x1x2x128xf32>
    %125 = vector.shape_cast %124 : vector<1x1x2x128xf32> to vector<2x128xf32>
    %c24 = arith.constant 24 : index
    %126 = memref.load %arg2[%c24] : memref<32xf32, #tpu.memory_space<smem>>
    %127 = vector.broadcast %126 : f32 to vector<2x128xf32>
    %128 = arith.mulf %121, %127 : vector<2x128xf32>
    %c25 = arith.constant 25 : index
    %129 = memref.load %arg2[%c25] : memref<32xf32, #tpu.memory_space<smem>>
    %130 = vector.broadcast %129 : f32 to vector<2x128xf32>
    %131 = arith.mulf %123, %130 : vector<2x128xf32>
    %132 = arith.addf %128, %131 : vector<2x128xf32>
    %c26 = arith.constant 26 : index
    %133 = memref.load %arg2[%c26] : memref<32xf32, #tpu.memory_space<smem>>
    %134 = vector.broadcast %133 : f32 to vector<2x128xf32>
    %135 = arith.mulf %125, %134 : vector<2x128xf32>
    %136 = arith.addf %132, %135 : vector<2x128xf32>
    %c30 = arith.constant 30 : index
    %137 = memref.load %arg2[%c30] : memref<32xf32, #tpu.memory_space<smem>>
    %138 = vector.broadcast %137 : f32 to vector<2x128xf32>
    %139 = arith.addf %136, %138 : vector<2x128xf32>
    %c3_72 = arith.constant 3 : index
    %c0_73 = arith.constant 0 : index
    %c0_74 = arith.constant 0 : index
    %c0_75 = arith.constant 0 : index
    %140 = vector.load %arg4[%c3_72, %c0_73, %c0_74, %c0_75] : memref<8x2x2x128xf32, #tpu.memory_space<vmem>>, vector<1x1x2x128xf32>
    %141 = vector.shape_cast %140 : vector<1x1x2x128xf32> to vector<2x128xf32>
    %142 = vector.shape_cast %139 : vector<2x128xf32> to vector<1x1x2x128xf32>
    tpu.vector_store %arg4[%c3_72, %c0_73, %c0_74, %c0_75], %142 {strides = array<i32>} : memref<8x2x2x128xf32, #tpu.memory_space<vmem>>, vector<1x1x2x128xf32>,
    %c27 = arith.constant 27 : index
    %143 = memref.load %arg2[%c27] : memref<32xf32, #tpu.memory_space<smem>>
    %144 = vector.broadcast %143 : f32 to vector<2x128xf32>
    %145 = arith.mulf %121, %144 : vector<2x128xf32>
    %c28 = arith.constant 28 : index
    %146 = memref.load %arg2[%c28] : memref<32xf32, #tpu.memory_space<smem>>
    %147 = vector.broadcast %146 : f32 to vector<2x128xf32>
    %148 = arith.mulf %123, %147 : vector<2x128xf32>
    %149 = arith.addf %145, %148 : vector<2x128xf32>
    %c29 = arith.constant 29 : index
    %150 = memref.load %arg2[%c29] : memref<32xf32, #tpu.memory_space<smem>>
    %151 = vector.broadcast %150 : f32 to vector<2x128xf32>
    %152 = arith.mulf %125, %151 : vector<2x128xf32>
    %153 = arith.addf %149, %152 : vector<2x128xf32>
    %c31 = arith.constant 31 : index
    %154 = memref.load %arg2[%c31] : memref<32xf32, #tpu.memory_space<smem>>
    %155 = vector.broadcast %154 : f32 to vector<2x128xf32>
    %156 = arith.addf %153, %155 : vector<2x128xf32>
    %c3_76 = arith.constant 3 : index
    %c1_77 = arith.constant 1 : index
    %c0_78 = arith.constant 0 : index
    %c0_79 = arith.constant 0 : index
    %157 = vector.load %arg4[%c3_76, %c1_77, %c0_78, %c0_79] : memref<8x2x2x128xf32, #tpu.memory_space<vmem>>, vector<1x1x2x128xf32>
    %158 = vector.shape_cast %157 : vector<1x1x2x128xf32> to vector<2x128xf32>
    %159 = vector.shape_cast %156 : vector<2x128xf32> to vector<1x1x2x128xf32>
    tpu.vector_store %arg4[%c3_76, %c1_77, %c0_78, %c0_79], %159 {strides = array<i32>} : memref<8x2x2x128xf32, #tpu.memory_space<vmem>>, vector<1x1x2x128xf32>,
    %c4_80 = arith.constant 4 : index
    %c0_81 = arith.constant 0 : index
    %c0_82 = arith.constant 0 : index
    %c0_83 = arith.constant 0 : index
    %160 = vector.load %arg3[%c4_80, %c0_81, %c0_82, %c0_83] : memref<8x3x2x128xf32, #tpu.memory_space<vmem>>, vector<1x1x2x128xf32>
    %161 = vector.shape_cast %160 : vector<1x1x2x128xf32> to vector<2x128xf32>
    %c4_84 = arith.constant 4 : index
    %c1_85 = arith.constant 1 : index
    %c0_86 = arith.constant 0 : index
    %c0_87 = arith.constant 0 : index
    %162 = vector.load %arg3[%c4_84, %c1_85, %c0_86, %c0_87] : memref<8x3x2x128xf32, #tpu.memory_space<vmem>>, vector<1x1x2x128xf32>
    %163 = vector.shape_cast %162 : vector<1x1x2x128xf32> to vector<2x128xf32>
    %c4_88 = arith.constant 4 : index
    %c2_89 = arith.constant 2 : index
    %c0_90 = arith.constant 0 : index
    %c0_91 = arith.constant 0 : index
    %164 = vector.load %arg3[%c4_88, %c2_89, %c0_90, %c0_91] : memref<8x3x2x128xf32, #tpu.memory_space<vmem>>, vector<1x1x2x128xf32>
    %165 = vector.shape_cast %164 : vector<1x1x2x128xf32> to vector<2x128xf32>
    %c0_92 = arith.constant 0 : index
    %166 = memref.load %arg2[%c0_92] : memref<32xf32, #tpu.memory_space<smem>>
    %167 = vector.broadcast %166 : f32 to vector<2x128xf32>
    %168 = arith.mulf %161, %167 : vector<2x128xf32>
    %c1_93 = arith.constant 1 : index
    %169 = memref.load %arg2[%c1_93] : memref<32xf32, #tpu.memory_space<smem>>
    %170 = vector.broadcast %169 : f32 to vector<2x128xf32>
    %171 = arith.mulf %163, %170 : vector<2x128xf32>
    %172 = arith.addf %168, %171 : vector<2x128xf32>
    %c2_94 = arith.constant 2 : index
    %173 = memref.load %arg2[%c2_94] : memref<32xf32, #tpu.memory_space<smem>>
    %174 = vector.broadcast %173 : f32 to vector<2x128xf32>
    %175 = arith.mulf %165, %174 : vector<2x128xf32>
    %176 = arith.addf %172, %175 : vector<2x128xf32>
    %c6_95 = arith.constant 6 : index
    %177 = memref.load %arg2[%c6_95] : memref<32xf32, #tpu.memory_space<smem>>
    %178 = vector.broadcast %177 : f32 to vector<2x128xf32>
    %179 = arith.addf %176, %178 : vector<2x128xf32>
    %c4_96 = arith.constant 4 : index
    %c0_97 = arith.constant 0 : index
    %c0_98 = arith.constant 0 : index
    %c0_99 = arith.constant 0 : index
    %180 = vector.load %arg4[%c4_96, %c0_97, %c0_98, %c0_99] : memref<8x2x2x128xf32, #tpu.memory_space<vmem>>, vector<1x1x2x128xf32>
    %181 = vector.shape_cast %180 : vector<1x1x2x128xf32> to vector<2x128xf32>
    %182 = vector.shape_cast %179 : vector<2x128xf32> to vector<1x1x2x128xf32>
    tpu.vector_store %arg4[%c4_96, %c0_97, %c0_98, %c0_99], %182 {strides = array<i32>} : memref<8x2x2x128xf32, #tpu.memory_space<vmem>>, vector<1x1x2x128xf32>,
    %c3_100 = arith.constant 3 : index
    %183 = memref.load %arg2[%c3_100] : memref<32xf32, #tpu.memory_space<smem>>
    %184 = vector.broadcast %183 : f32 to vector<2x128xf32>
    %185 = arith.mulf %161, %184 : vector<2x128xf32>
    %c4_101 = arith.constant 4 : index
    %186 = memref.load %arg2[%c4_101] : memref<32xf32, #tpu.memory_space<smem>>
    %187 = vector.broadcast %186 : f32 to vector<2x128xf32>
    %188 = arith.mulf %163, %187 : vector<2x128xf32>
    %189 = arith.addf %185, %188 : vector<2x128xf32>
    %c5_102 = arith.constant 5 : index
    %190 = memref.load %arg2[%c5_102] : memref<32xf32, #tpu.memory_space<smem>>
    %191 = vector.broadcast %190 : f32 to vector<2x128xf32>
    %192 = arith.mulf %165, %191 : vector<2x128xf32>
    %193 = arith.addf %189, %192 : vector<2x128xf32>
    %c7_103 = arith.constant 7 : index
    %194 = memref.load %arg2[%c7_103] : memref<32xf32, #tpu.memory_space<smem>>
    %195 = vector.broadcast %194 : f32 to vector<2x128xf32>
    %196 = arith.addf %193, %195 : vector<2x128xf32>
    %c4_104 = arith.constant 4 : index
    %c1_105 = arith.constant 1 : index
    %c0_106 = arith.constant 0 : index
    %c0_107 = arith.constant 0 : index
    %197 = vector.load %arg4[%c4_104, %c1_105, %c0_106, %c0_107] : memref<8x2x2x128xf32, #tpu.memory_space<vmem>>, vector<1x1x2x128xf32>
    %198 = vector.shape_cast %197 : vector<1x1x2x128xf32> to vector<2x128xf32>
    %199 = vector.shape_cast %196 : vector<2x128xf32> to vector<1x1x2x128xf32>
    tpu.vector_store %arg4[%c4_104, %c1_105, %c0_106, %c0_107], %199 {strides = array<i32>} : memref<8x2x2x128xf32, #tpu.memory_space<vmem>>, vector<1x1x2x128xf32>,
    %c5_108 = arith.constant 5 : index
    %c0_109 = arith.constant 0 : index
    %c0_110 = arith.constant 0 : index
    %c0_111 = arith.constant 0 : index
    %200 = vector.load %arg3[%c5_108, %c0_109, %c0_110, %c0_111] : memref<8x3x2x128xf32, #tpu.memory_space<vmem>>, vector<1x1x2x128xf32>
    %201 = vector.shape_cast %200 : vector<1x1x2x128xf32> to vector<2x128xf32>
    %c5_112 = arith.constant 5 : index
    %c1_113 = arith.constant 1 : index
    %c0_114 = arith.constant 0 : index
    %c0_115 = arith.constant 0 : index
    %202 = vector.load %arg3[%c5_112, %c1_113, %c0_114, %c0_115] : memref<8x3x2x128xf32, #tpu.memory_space<vmem>>, vector<1x1x2x128xf32>
    %203 = vector.shape_cast %202 : vector<1x1x2x128xf32> to vector<2x128xf32>
    %c5_116 = arith.constant 5 : index
    %c2_117 = arith.constant 2 : index
    %c0_118 = arith.constant 0 : index
    %c0_119 = arith.constant 0 : index
    %204 = vector.load %arg3[%c5_116, %c2_117, %c0_118, %c0_119] : memref<8x3x2x128xf32, #tpu.memory_space<vmem>>, vector<1x1x2x128xf32>
    %205 = vector.shape_cast %204 : vector<1x1x2x128xf32> to vector<2x128xf32>
    %c8_120 = arith.constant 8 : index
    %206 = memref.load %arg2[%c8_120] : memref<32xf32, #tpu.memory_space<smem>>
    %207 = vector.broadcast %206 : f32 to vector<2x128xf32>
    %208 = arith.mulf %201, %207 : vector<2x128xf32>
    %c9_121 = arith.constant 9 : index
    %209 = memref.load %arg2[%c9_121] : memref<32xf32, #tpu.memory_space<smem>>
    %210 = vector.broadcast %209 : f32 to vector<2x128xf32>
    %211 = arith.mulf %203, %210 : vector<2x128xf32>
    %212 = arith.addf %208, %211 : vector<2x128xf32>
    %c10_122 = arith.constant 10 : index
    %213 = memref.load %arg2[%c10_122] : memref<32xf32, #tpu.memory_space<smem>>
    %214 = vector.broadcast %213 : f32 to vector<2x128xf32>
    %215 = arith.mulf %205, %214 : vector<2x128xf32>
    %216 = arith.addf %212, %215 : vector<2x128xf32>
    %c14_123 = arith.constant 14 : index
    %217 = memref.load %arg2[%c14_123] : memref<32xf32, #tpu.memory_space<smem>>
    %218 = vector.broadcast %217 : f32 to vector<2x128xf32>
    %219 = arith.addf %216, %218 : vector<2x128xf32>
    %c5_124 = arith.constant 5 : index
    %c0_125 = arith.constant 0 : index
    %c0_126 = arith.constant 0 : index
    %c0_127 = arith.constant 0 : index
    %220 = vector.load %arg4[%c5_124, %c0_125, %c0_126, %c0_127] : memref<8x2x2x128xf32, #tpu.memory_space<vmem>>, vector<1x1x2x128xf32>
    %221 = vector.shape_cast %220 : vector<1x1x2x128xf32> to vector<2x128xf32>
    %222 = vector.shape_cast %219 : vector<2x128xf32> to vector<1x1x2x128xf32>
    tpu.vector_store %arg4[%c5_124, %c0_125, %c0_126, %c0_127], %222 {strides = array<i32>} : memref<8x2x2x128xf32, #tpu.memory_space<vmem>>, vector<1x1x2x128xf32>,
    %c11_128 = arith.constant 11 : index
    %223 = memref.load %arg2[%c11_128] : memref<32xf32, #tpu.memory_space<smem>>
    %224 = vector.broadcast %223 : f32 to vector<2x128xf32>
    %225 = arith.mulf %201, %224 : vector<2x128xf32>
    %c12_129 = arith.constant 12 : index
    %226 = memref.load %arg2[%c12_129] : memref<32xf32, #tpu.memory_space<smem>>
    %227 = vector.broadcast %226 : f32 to vector<2x128xf32>
    %228 = arith.mulf %203, %227 : vector<2x128xf32>
    %229 = arith.addf %225, %228 : vector<2x128xf32>
    %c13_130 = arith.constant 13 : index
    %230 = memref.load %arg2[%c13_130] : memref<32xf32, #tpu.memory_space<smem>>
    %231 = vector.broadcast %230 : f32 to vector<2x128xf32>
    %232 = arith.mulf %205, %231 : vector<2x128xf32>
    %233 = arith.addf %229, %232 : vector<2x128xf32>
    %c15_131 = arith.constant 15 : index
    %234 = memref.load %arg2[%c15_131] : memref<32xf32, #tpu.memory_space<smem>>
    %235 = vector.broadcast %234 : f32 to vector<2x128xf32>
    %236 = arith.addf %233, %235 : vector<2x128xf32>
    %c5_132 = arith.constant 5 : index
    %c1_133 = arith.constant 1 : index
    %c0_134 = arith.constant 0 : index
    %c0_135 = arith.constant 0 : index
    %237 = vector.load %arg4[%c5_132, %c1_133, %c0_134, %c0_135] : memref<8x2x2x128xf32, #tpu.memory_space<vmem>>, vector<1x1x2x128xf32>
    %238 = vector.shape_cast %237 : vector<1x1x2x128xf32> to vector<2x128xf32>
    %239 = vector.shape_cast %236 : vector<2x128xf32> to vector<1x1x2x128xf32>
    tpu.vector_store %arg4[%c5_132, %c1_133, %c0_134, %c0_135], %239 {strides = array<i32>} : memref<8x2x2x128xf32, #tpu.memory_space<vmem>>, vector<1x1x2x128xf32>,
    %c6_136 = arith.constant 6 : index
    %c0_137 = arith.constant 0 : index
    %c0_138 = arith.constant 0 : index
    %c0_139 = arith.constant 0 : index
    %240 = vector.load %arg3[%c6_136, %c0_137, %c0_138, %c0_139] : memref<8x3x2x128xf32, #tpu.memory_space<vmem>>, vector<1x1x2x128xf32>
    %241 = vector.shape_cast %240 : vector<1x1x2x128xf32> to vector<2x128xf32>
    %c6_140 = arith.constant 6 : index
    %c1_141 = arith.constant 1 : index
    %c0_142 = arith.constant 0 : index
    %c0_143 = arith.constant 0 : index
    %242 = vector.load %arg3[%c6_140, %c1_141, %c0_142, %c0_143] : memref<8x3x2x128xf32, #tpu.memory_space<vmem>>, vector<1x1x2x128xf32>
    %243 = vector.shape_cast %242 : vector<1x1x2x128xf32> to vector<2x128xf32>
    %c6_144 = arith.constant 6 : index
    %c2_145 = arith.constant 2 : index
    %c0_146 = arith.constant 0 : index
    %c0_147 = arith.constant 0 : index
    %244 = vector.load %arg3[%c6_144, %c2_145, %c0_146, %c0_147] : memref<8x3x2x128xf32, #tpu.memory_space<vmem>>, vector<1x1x2x128xf32>
    %245 = vector.shape_cast %244 : vector<1x1x2x128xf32> to vector<2x128xf32>
    %c16_148 = arith.constant 16 : index
    %246 = memref.load %arg2[%c16_148] : memref<32xf32, #tpu.memory_space<smem>>
    %247 = vector.broadcast %246 : f32 to vector<2x128xf32>
    %248 = arith.mulf %241, %247 : vector<2x128xf32>
    %c17_149 = arith.constant 17 : index
    %249 = memref.load %arg2[%c17_149] : memref<32xf32, #tpu.memory_space<smem>>
    %250 = vector.broadcast %249 : f32 to vector<2x128xf32>
    %251 = arith.mulf %243, %250 : vector<2x128xf32>
    %252 = arith.addf %248, %251 : vector<2x128xf32>
    %c18_150 = arith.constant 18 : index
    %253 = memref.load %arg2[%c18_150] : memref<32xf32, #tpu.memory_space<smem>>
    %254 = vector.broadcast %253 : f32 to vector<2x128xf32>
    %255 = arith.mulf %245, %254 : vector<2x128xf32>
    %256 = arith.addf %252, %255 : vector<2x128xf32>
    %c22_151 = arith.constant 22 : index
    %257 = memref.load %arg2[%c22_151] : memref<32xf32, #tpu.memory_space<smem>>
    %258 = vector.broadcast %257 : f32 to vector<2x128xf32>
    %259 = arith.addf %256, %258 : vector<2x128xf32>
    %c6_152 = arith.constant 6 : index
    %c0_153 = arith.constant 0 : index
    %c0_154 = arith.constant 0 : index
    %c0_155 = arith.constant 0 : index
    %260 = vector.load %arg4[%c6_152, %c0_153, %c0_154, %c0_155] : memref<8x2x2x128xf32, #tpu.memory_space<vmem>>, vector<1x1x2x128xf32>
    %261 = vector.shape_cast %260 : vector<1x1x2x128xf32> to vector<2x128xf32>
    %262 = vector.shape_cast %259 : vector<2x128xf32> to vector<1x1x2x128xf32>
    tpu.vector_store %arg4[%c6_152, %c0_153, %c0_154, %c0_155], %262 {strides = array<i32>} : memref<8x2x2x128xf32, #tpu.memory_space<vmem>>, vector<1x1x2x128xf32>,
    %c19_156 = arith.constant 19 : index
    %263 = memref.load %arg2[%c19_156] : memref<32xf32, #tpu.memory_space<smem>>
    %264 = vector.broadcast %263 : f32 to vector<2x128xf32>
    %265 = arith.mulf %241, %264 : vector<2x128xf32>
    %c20_157 = arith.constant 20 : index
    %266 = memref.load %arg2[%c20_157] : memref<32xf32, #tpu.memory_space<smem>>
    %267 = vector.broadcast %266 : f32 to vector<2x128xf32>
    %268 = arith.mulf %243, %267 : vector<2x128xf32>
    %269 = arith.addf %265, %268 : vector<2x128xf32>
    %c21_158 = arith.constant 21 : index
    %270 = memref.load %arg2[%c21_158] : memref<32xf32, #tpu.memory_space<smem>>
    %271 = vector.broadcast %270 : f32 to vector<2x128xf32>
    %272 = arith.mulf %245, %271 : vector<2x128xf32>
    %273 = arith.addf %269, %272 : vector<2x128xf32>
    %c23_159 = arith.constant 23 : index
    %274 = memref.load %arg2[%c23_159] : memref<32xf32, #tpu.memory_space<smem>>
    %275 = vector.broadcast %274 : f32 to vector<2x128xf32>
    %276 = arith.addf %273, %275 : vector<2x128xf32>
    %c6_160 = arith.constant 6 : index
    %c1_161 = arith.constant 1 : index
    %c0_162 = arith.constant 0 : index
    %c0_163 = arith.constant 0 : index
    %277 = vector.load %arg4[%c6_160, %c1_161, %c0_162, %c0_163] : memref<8x2x2x128xf32, #tpu.memory_space<vmem>>, vector<1x1x2x128xf32>
    %278 = vector.shape_cast %277 : vector<1x1x2x128xf32> to vector<2x128xf32>
    %279 = vector.shape_cast %276 : vector<2x128xf32> to vector<1x1x2x128xf32>
    tpu.vector_store %arg4[%c6_160, %c1_161, %c0_162, %c0_163], %279 {strides = array<i32>} : memref<8x2x2x128xf32, #tpu.memory_space<vmem>>, vector<1x1x2x128xf32>,
    %c7_164 = arith.constant 7 : index
    %c0_165 = arith.constant 0 : index
    %c0_166 = arith.constant 0 : index
    %c0_167 = arith.constant 0 : index
    %280 = vector.load %arg3[%c7_164, %c0_165, %c0_166, %c0_167] : memref<8x3x2x128xf32, #tpu.memory_space<vmem>>, vector<1x1x2x128xf32>
    %281 = vector.shape_cast %280 : vector<1x1x2x128xf32> to vector<2x128xf32>
    %c7_168 = arith.constant 7 : index
    %c1_169 = arith.constant 1 : index
    %c0_170 = arith.constant 0 : index
    %c0_171 = arith.constant 0 : index
    %282 = vector.load %arg3[%c7_168, %c1_169, %c0_170, %c0_171] : memref<8x3x2x128xf32, #tpu.memory_space<vmem>>, vector<1x1x2x128xf32>
    %283 = vector.shape_cast %282 : vector<1x1x2x128xf32> to vector<2x128xf32>
    %c7_172 = arith.constant 7 : index
    %c2_173 = arith.constant 2 : index
    %c0_174 = arith.constant 0 : index
    %c0_175 = arith.constant 0 : index
    %284 = vector.load %arg3[%c7_172, %c2_173, %c0_174, %c0_175] : memref<8x3x2x128xf32, #tpu.memory_space<vmem>>, vector<1x1x2x128xf32>
    %285 = vector.shape_cast %284 : vector<1x1x2x128xf32> to vector<2x128xf32>
    %c24_176 = arith.constant 24 : index
    %286 = memref.load %arg2[%c24_176] : memref<32xf32, #tpu.memory_space<smem>>
    %287 = vector.broadcast %286 : f32 to vector<2x128xf32>
    %288 = arith.mulf %281, %287 : vector<2x128xf32>
    %c25_177 = arith.constant 25 : index
    %289 = memref.load %arg2[%c25_177] : memref<32xf32, #tpu.memory_space<smem>>
    %290 = vector.broadcast %289 : f32 to vector<2x128xf32>
    %291 = arith.mulf %283, %290 : vector<2x128xf32>
    %292 = arith.addf %288, %291 : vector<2x128xf32>
    %c26_178 = arith.constant 26 : index
    %293 = memref.load %arg2[%c26_178] : memref<32xf32, #tpu.memory_space<smem>>
    %294 = vector.broadcast %293 : f32 to vector<2x128xf32>
    %295 = arith.mulf %285, %294 : vector<2x128xf32>
    %296 = arith.addf %292, %295 : vector<2x128xf32>
    %c30_179 = arith.constant 30 : index
    %297 = memref.load %arg2[%c30_179] : memref<32xf32, #tpu.memory_space<smem>>
    %298 = vector.broadcast %297 : f32 to vector<2x128xf32>
    %299 = arith.addf %296, %298 : vector<2x128xf32>
    %c7_180 = arith.constant 7 : index
    %c0_181 = arith.constant 0 : index
    %c0_182 = arith.constant 0 : index
    %c0_183 = arith.constant 0 : index
    %300 = vector.load %arg4[%c7_180, %c0_181, %c0_182, %c0_183] : memref<8x2x2x128xf32, #tpu.memory_space<vmem>>, vector<1x1x2x128xf32>
    %301 = vector.shape_cast %300 : vector<1x1x2x128xf32> to vector<2x128xf32>
    %302 = vector.shape_cast %299 : vector<2x128xf32> to vector<1x1x2x128xf32>
    tpu.vector_store %arg4[%c7_180, %c0_181, %c0_182, %c0_183], %302 {strides = array<i32>} : memref<8x2x2x128xf32, #tpu.memory_space<vmem>>, vector<1x1x2x128xf32>,
    %c27_184 = arith.constant 27 : index
    %303 = memref.load %arg2[%c27_184] : memref<32xf32, #tpu.memory_space<smem>>
    %304 = vector.broadcast %303 : f32 to vector<2x128xf32>
    %305 = arith.mulf %281, %304 : vector<2x128xf32>
    %c28_185 = arith.constant 28 : index
    %306 = memref.load %arg2[%c28_185] : memref<32xf32, #tpu.memory_space<smem>>
    %307 = vector.broadcast %306 : f32 to vector<2x128xf32>
    %308 = arith.mulf %283, %307 : vector<2x128xf32>
    %309 = arith.addf %305, %308 : vector<2x128xf32>
    %c29_186 = arith.constant 29 : index
    %310 = memref.load %arg2[%c29_186] : memref<32xf32, #tpu.memory_space<smem>>
    %311 = vector.broadcast %310 : f32 to vector<2x128xf32>
    %312 = arith.mulf %285, %311 : vector<2x128xf32>
    %313 = arith.addf %309, %312 : vector<2x128xf32>
    %c31_187 = arith.constant 31 : index
    %314 = memref.load %arg2[%c31_187] : memref<32xf32, #tpu.memory_space<smem>>
    %315 = vector.broadcast %314 : f32 to vector<2x128xf32>
    %316 = arith.addf %313, %315 : vector<2x128xf32>
    %c7_188 = arith.constant 7 : index
    %c1_189 = arith.constant 1 : index
    %c0_190 = arith.constant 0 : index
    %c0_191 = arith.constant 0 : index
    %317 = vector.load %arg4[%c7_188, %c1_189, %c0_190, %c0_191] : memref<8x2x2x128xf32, #tpu.memory_space<vmem>>, vector<1x1x2x128xf32>
    %318 = vector.shape_cast %317 : vector<1x1x2x128xf32> to vector<2x128xf32>
    %319 = vector.shape_cast %316 : vector<2x128xf32> to vector<1x1x2x128xf32>
    tpu.vector_store %arg4[%c7_188, %c1_189, %c0_190, %c0_191], %319 {strides = array<i32>} : memref<8x2x2x128xf32, #tpu.memory_space<vmem>>, vector<1x1x2x128xf32>,
    return
  }
  func.func @transform_0(%arg0: i32, %arg1: i32) -> i32 {
    %c0_i32 = arith.constant 0 : i32
    %c0_i32_0 = arith.constant 0 : i32
    return %c0_i32 : i32
  }
  func.func @transform_1(%arg0: i32, %arg1: i32) -> (i32, i32, i32, i32) {
    %c0_i32 = arith.constant 0 : i32
    %c0_i32_0 = arith.constant 0 : i32
    %c0_i32_1 = arith.constant 0 : i32
    return %arg0, %c0_i32, %arg1, %c0_i32_0 : i32, i32, i32, i32
  }
  func.func @transform_2(%arg0: i32, %arg1: i32) -> (i32, i32, i32, i32) {
    %c0_i32 = arith.constant 0 : i32
    %c0_i32_0 = arith.constant 0 : i32
    %c0_i32_1 = arith.constant 0 : i32
    return %arg0, %c0_i32, %arg1, %c0_i32_0 : i32, i32, i32, i32
  }
}

</mosaic_0001>

<bundles_post_ra>
// kernel: tpu_custom_call.1
= control target key start
LH: loop header
LB: loop body
LE: loop exit
PB: predicated region body
PF: predicated region fallthrough
CT: control target
= control target key end

     0   :  { %7 = vsyncpa [#allocation5], 0  ;;  %s615_s0 = inlined_call_operand.hbm [shape: f32[32], index: 0, kind: input, shape index: {}]   ;;  %s616_s1 = inlined_call_operand.hbm [shape: f32[8,3,2,128], index: 1, kind: input, shape index: {}]   ;;  %s617_s2 = inlined_call_operand.hbm [shape: f32[8,2,2,128], index: 2, kind: output, shape index: {}]  }
   0x1   :  { %8 = vsyncpa [#allocation3], 0 }
   0x2   :  { %9 = vsyncpa [#allocation4], 0  ;;  %s15_s11 = sshll.u32 %s615_s0, 4  ;;  %s23_s14 = sshll.u32 %s616_s1, 4  ;;  %s16_s11 = int_to_ptr.hbm [resolvable:$true] %s15_s11  ;;  %s24_s14 = int_to_ptr.hbm [resolvable:$true] %s23_s14 }
   0x3   :  { %s496_s15 = smov [#allocation2]   ;;  %s497_s16 = smov [#allocation6]  }
   0x4   :  { %18 = dma.hbm_to_smem %s16_s11, 16, %s496_s15, [#allocation5]  }
   0x5   :  { %s25_s17 = sshll.u32 %s497_s16, 4  ;;  %s498_s18 = smov 32   ;;  %s26_s17 = int_to_ptr.vmem [resolvable:$true] %s25_s17 }
   0x6   :  { %s499_s19 = smov 2  }
   0x7   :  { %31 = dma.hbm_to_vmem [thread:$0]  %s24_s14, 768, %s26_s17, [#allocation3], %s498_s18, %s498_s18, %s499_s19  }
   0x8   :  { %490 = dma.done.wait [#allocation5], 16  }
   0x9   :  { %491 = vsyncadd [#allocation5], 4294967280 }
   0xa   :  { %492 = dma.done.wait [#allocation3], 768  }
   0xb   :  { %493 = vsyncadd [#allocation3], 4294966528 }
   0xc   :  { %40 = sfence }
   0xd   :  { %s46_s0 = sld [smem:[#allocation2]]  ;;  %v41_v0 = vld [vmem:[#allocation6] sm:$0x3]  ;;  %v192_v1 = vld [vmem:[#allocation6 + $0x18] sm:$0x3] }
   0xe   :  { %s363_s20 = sld [smem:[#allocation2 + $0x1]]  ;;  %v43_v2 = vld [vmem:[#allocation6 + $0x2] sm:$0x3]  ;;  %v194_v3 = vld [vmem:[#allocation6 + $0x1a] sm:$0x3] }
   0xf   :  { %s364_s1 = sld [smem:[#allocation2 + $0x2]]  ;;  %v45_v4 = vld [vmem:[#allocation6 + $0x4] sm:$0x3]  ;;  %v196_v6 = vld [vmem:[#allocation6 + $0x1c] sm:$0x3] }
  0x10   :  { %s525_s21 = sld [smem:[#allocation2 + $0x6]]  ;;  %v78_v25 = vld [vmem:[#allocation6 + $0x6] sm:$0x3]  ;;  %v230_v27 = vld [vmem:[#allocation6 + $0x1e] sm:$0x3] }
  0x11   :  { %s366_s22 = sld [smem:[#allocation2 + $0x3]]  ;;  %v80_v30 = vld [vmem:[#allocation6 + $0x8] sm:$0x3]  ;;  %v232_v33 = vld [vmem:[#allocation6 + $0x20] sm:$0x3] }
  0x12   :  { %s527_s23 = sld [smem:[#allocation2 + $0x4]]  ;;  %v82_v36 = vld [vmem:[#allocation6 + $0xa] sm:$0x3]  ;;  %v234_v39 = vld [vmem:[#allocation6 + $0x22] sm:$0x3] }
  0x13   :  { %v47_v5 = vstv %s46_s0  ;;  %s529_s24 = sld [smem:[#allocation2 + $0x5]]  ;;  %v116_v58 = vld [vmem:[#allocation6 + $0xc] sm:$0x3]  ;;  %v118_v59 = vld [vmem:[#allocation6 + $0xe] sm:$0x3] }
  0x14   :  { %v48_v7 = vmul.f32 %v47_v5, %v41_v0  ;;  %v50_v8 = vstv %s363_s20  ;;  %s531_s25 = sld [smem:[#allocation2 + $0x7]]  ;;  %v199_v9 = vmul.f32 %v192_v1, %v47_v5 }
  0x15   :  { %v51_v10 = vmul.f32 %v50_v8, %v43_v2  ;;  %v54_v11 = vstv %s364_s1  ;;  %s533_s26 = sld [smem:[#allocation2 + $0x8]]  ;;  %v202_v12 = vmul.f32 %v194_v3, %v50_v8 }
  0x16   :  { %v55_v13 = vmul.f32 %v54_v11, %v45_v4  ;;  %s535_s27 = sld [smem:[#allocation2 + $0x9]]  ;;  %v206_v14 = vmul.f32 %v196_v6, %v54_v11  ;;  %v58_v18 = vstv %s525_s21 }
  0x17   :  { %v52_v15 = vadd.f32 %v51_v10, %v48_v7  ;;  %v62_v16 = vstv %s366_s22  ;;  %s537_s28 = sld [smem:[#allocation2 + $0xa]]  ;;  %v203_v17 = vadd.f32 %v202_v12, %v199_v9  ;;  %v270_v7 = vld [vmem:[#allocation6 + $0x26] sm:$0x3]  ;;  %v120_v10 = vld [vmem:[#allocation6 + $0x10] sm:$0x3]  ;;  %s500_s22 = smov [#allocation7]  }
  0x18   :  { %v63_v19 = vmul.f32 %v62_v16, %v41_v0  ;;  %v65_v20 = vstv %s527_s23  ;;  %s541_s29 = sld [smem:[#allocation2 + $0xe]]  ;;  %v215_v21 = vmul.f32 %v192_v1, %v62_v16  ;;  %s347_s23 = sshll.u32 %s500_s22, 4  ;;  %s348_s23 = int_to_ptr.vmem [resolvable:$true] %s347_s23 }
  0x19   :  { %v56_v22 = vadd.f32 %v55_v13, %v52_v15  ;;  %v66_v23 = vmul.f32 %v65_v20, %v43_v2  ;;  %v69_v24 = vstv %s529_s24  ;;  %s544_s30 = sld [smem:[#allocation2 + $0xb]]  ;;  %v207_v26 = vadd.f32 %v206_v14, %v203_v17  ;;  %v268_v2 = vld [vmem:[#allocation6 + $0x24] sm:$0x3]  ;;  %v272_v13 = vld [vmem:[#allocation6 + $0x28] sm:$0x3] }
  0x1a   :  { %v70_v28 = vmul.f32 %v69_v24, %v45_v4  ;;  %v73_v29 = vstv %s531_s25  ;;  %s547_s3 = sld [smem:[#allocation2 + $0xc]]  ;;  %v218_v31 = vmul.f32 %v194_v3, %v65_v20  ;;  %v222_v32 = vmul.f32 %v196_v6, %v69_v24 }
  0x1b   :  { %v59_v34 = vadd.f32 %v58_v18, %v56_v22  ;;  %v67_v35 = vadd.f32 %v66_v23, %v63_v19  ;;  %v84_v37 = vstv %s533_s26  ;;  %s550_s4 = sld [smem:[#allocation2 + $0xd]]  ;;  %v210_v38 = vadd.f32 %v207_v26, %v58_v18  ;;  %s349_s26 = sshll.u32 %s617_s2, 4  ;;  %s350_s26 = int_to_ptr.hbm [resolvable:$true] %s349_s26 }
  0x1c   :  { %v85_v40 = vmul.f32 %v84_v37, %v78_v25  ;;  %v87_v41 = vstv %s535_s27  ;;  %s553_s5 = sld [smem:[#allocation2 + $0xf]]  ;;  %v219_v42 = vadd.f32 %v218_v31, %v215_v21  ;;  %v237_v43 = vmul.f32 %v230_v27, %v84_v37 }
  0x1d   :  { %60 = vst [vmem:[#allocation7] sm:$0x3] %v59_v34  ;;  %v71_v44 = vadd.f32 %v70_v28, %v67_v35  ;;  %v88_v45 = vmul.f32 %v87_v41, %v80_v30  ;;  %v91_v46 = vstv %s537_s28  ;;  %s556_s6 = sld [smem:[#allocation2 + $0x10]]  ;;  %v240_v47 = vmul.f32 %v232_v33, %v87_v41 }
  0x1e   :  { %v92_v48 = vmul.f32 %v91_v46, %v82_v36  ;;  %v95_v49 = vstv %s541_s29  ;;  %s559_s7 = sld [smem:[#allocation2 + $0x11]]  ;;  %212 = vst [vmem:[#allocation7 + $0x10] sm:$0x3] %v210_v38  ;;  %v223_v50 = vadd.f32 %v222_v32, %v219_v42  ;;  %v244_v51 = vmul.f32 %v234_v39, %v91_v46  ;;  %v154_v32 = vld [vmem:[#allocation6 + $0x12] sm:$0x3] }
  0x1f   :  { %v74_v52 = vadd.f32 %v73_v29, %v71_v44  ;;  %v89_v53 = vadd.f32 %v88_v45, %v85_v40  ;;  %v100_v54 = vstv %s544_s30  ;;  %s562_s8 = sld [smem:[#allocation2 + $0x12]]  ;;  %v241_v55 = vadd.f32 %v240_v47, %v237_v43  ;;  %v306_v40 = vld [vmem:[#allocation6 + $0x2a] sm:$0x3]  ;;  %v308_v45 = vld [vmem:[#allocation6 + $0x2c] sm:$0x3] }
  0x20   :  { %v101_v56 = vmul.f32 %v100_v54, %v78_v25  ;;  %v103_v57 = vstv %s547_s3  ;;  %s565_s9 = sld [smem:[#allocation2 + $0x16]]  ;;  %v226_v60 = vadd.f32 %v223_v50, %v73_v29  ;;  %v253_v61 = vmul.f32 %v230_v27, %v100_v54 }
  0x21   :  { %76 = vst [vmem:[#allocation7 + $0x2] sm:$0x3] %v74_v52  ;;  %v93_v62 = vadd.f32 %v92_v48, %v89_v53  ;;  %v104_v63 = vmul.f32 %v103_v57, %v80_v30  ;;  %v107_v0 = vstv %s550_s4  ;;  %s568_s10 = sld [smem:[#allocation2 + $0x13]]  ;;  %v245_v1 = vadd.f32 %v244_v51, %v241_v55  ;;  %v158_v48 = vld [vmem:[#allocation6 + $0x16] sm:$0x3] }
  0x22   :  { %v108_v3 = vmul.f32 %v107_v0, %v82_v36  ;;  %v111_v4 = vstv %s553_s5  ;;  %s571_s11 = sld [smem:[#allocation2 + $0x14]]  ;;  %228 = vst [vmem:[#allocation7 + $0x12] sm:$0x3] %v226_v60  ;;  %v256_v5 = vmul.f32 %v232_v33, %v103_v57  ;;  %v260_v6 = vmul.f32 %v234_v39, %v107_v0  ;;  %v156_v33 = vld [vmem:[#allocation6 + $0x14] sm:$0x3] }
  0x23   :  { %v96_v8 = vadd.f32 %v95_v49, %v93_v62  ;;  %v105_v9 = vadd.f32 %v104_v63, %v101_v56  ;;  %v122_v11 = vstv %s556_s6  ;;  %s574_s12 = sld [smem:[#allocation2 + $0x15]]  ;;  %v248_v12 = vadd.f32 %v245_v1, %v95_v49  ;;  %v310_v51 = vld [vmem:[#allocation6 + $0x2e] sm:$0x3] }
  0x24   :  { %v123_v14 = vmul.f32 %v122_v11, %v116_v58  ;;  %v125_v15 = vstv %s559_s7  ;;  %s577_s13 = sld [smem:[#allocation2 + $0x17]]  ;;  %v257_v16 = vadd.f32 %v256_v5, %v253_v61  ;;  %v275_v17 = vmul.f32 %v268_v2, %v122_v11 }
  0x25   :  { %98 = vst [vmem:[#allocation7 + $0x4] sm:$0x3] %v96_v8  ;;  %v109_v18 = vadd.f32 %v108_v3, %v105_v9  ;;  %v126_v19 = vmul.f32 %v125_v15, %v118_v59  ;;  %v129_v20 = vstv %s562_s8  ;;  %s580_s14 = sld [smem:[#allocation2 + $0x18]]  ;;  %v278_v21 = vmul.f32 %v270_v7, %v125_v15 }
  0x26   :  { %v130_v22 = vmul.f32 %v129_v20, %v120_v10  ;;  %v133_v23 = vstv %s565_s9  ;;  %s583_s15 = sld [smem:[#allocation2 + $0x19]]  ;;  %250 = vst [vmem:[#allocation7 + $0x14] sm:$0x3] %v248_v12  ;;  %v261_v24 = vadd.f32 %v260_v6, %v257_v16  ;;  %v282_v25 = vmul.f32 %v272_v13, %v129_v20 }
  0x27   :  { %v112_v26 = vadd.f32 %v111_v4, %v109_v18  ;;  %v127_v27 = vadd.f32 %v126_v19, %v123_v14  ;;  %v138_v28 = vstv %s568_s10  ;;  %s586_s16 = sld [smem:[#allocation2 + $0x1a]]  ;;  %v279_v29 = vadd.f32 %v278_v21, %v275_v17 }
  0x28   :  { %v139_v30 = vmul.f32 %v138_v28, %v116_v58  ;;  %v141_v31 = vstv %s571_s11  ;;  %s589_s17 = sld [smem:[#allocation2 + $0x1e]]  ;;  %v264_v34 = vadd.f32 %v261_v24, %v111_v4  ;;  %v291_v35 = vmul.f32 %v268_v2, %v138_v28 }
  0x29   :  { %114 = vst [vmem:[#allocation7 + $0x6] sm:$0x3] %v112_v26  ;;  %v131_v36 = vadd.f32 %v130_v22, %v127_v27  ;;  %v142_v37 = vmul.f32 %v141_v31, %v118_v59  ;;  %v145_v38 = vstv %s574_s12  ;;  %s592_s0 = sld [smem:[#allocation2 + $0x1b]]  ;;  %v283_v39 = vadd.f32 %v282_v25, %v279_v29 }
  0x2a   :  { %v146_v41 = vmul.f32 %v145_v38, %v120_v10  ;;  %v149_v42 = vstv %s577_s13  ;;  %s595_s20 = sld [smem:[#allocation2 + $0x1c]]  ;;  %266 = vst [vmem:[#allocation7 + $0x16] sm:$0x3] %v264_v34  ;;  %v294_v43 = vmul.f32 %v270_v7, %v141_v31  ;;  %v298_v44 = vmul.f32 %v272_v13, %v145_v38 }
  0x2b   :  { %v134_v46 = vadd.f32 %v133_v23, %v131_v36  ;;  %v143_v47 = vadd.f32 %v142_v37, %v139_v30  ;;  %v160_v49 = vstv %s580_s14  ;;  %s598_s1 = sld [smem:[#allocation2 + $0x1d]]  ;;  %v286_v50 = vadd.f32 %v283_v39, %v133_v23 }
  0x2c   :  { %v161_v52 = vmul.f32 %v160_v49, %v154_v32  ;;  %v163_v53 = vstv %s583_s15  ;;  %s601_s21 = sld [smem:[#allocation2 + $0x1f]]  ;;  %v295_v54 = vadd.f32 %v294_v43, %v291_v35  ;;  %v313_v55 = vmul.f32 %v306_v40, %v160_v49 }
  0x2d   :  { %136 = vst [vmem:[#allocation7 + $0x8] sm:$0x3] %v134_v46  ;;  %v147_v56 = vadd.f32 %v146_v41, %v143_v47  ;;  %v164_v57 = vmul.f32 %v163_v53, %v156_v33  ;;  %v167_v58 = vstv %s586_s16  ;;  %v316_v59 = vmul.f32 %v308_v45, %v163_v53 }
  0x2e   :  { %v168_v60 = vmul.f32 %v167_v58, %v158_v48  ;;  %v171_v61 = vstv %s589_s17  ;;  %288 = vst [vmem:[#allocation7 + $0x18] sm:$0x3] %v286_v50  ;;  %v299_v62 = vadd.f32 %v298_v44, %v295_v54  ;;  %v320_v63 = vmul.f32 %v310_v51, %v167_v58 }
  0x2f   :  { %v150_v0 = vadd.f32 %v149_v42, %v147_v56  ;;  %v165_v1 = vadd.f32 %v164_v57, %v161_v52  ;;  %v176_v2 = vstv %s592_s0  ;;  %v317_v3 = vadd.f32 %v316_v59, %v313_v55 }
  0x30   :  { %v177_v4 = vmul.f32 %v176_v2, %v154_v32  ;;  %v179_v5 = vstv %s595_s20  ;;  %v302_v6 = vadd.f32 %v299_v62, %v149_v42  ;;  %v329_v7 = vmul.f32 %v306_v40, %v176_v2 }
  0x31   :  { %152 = vst [vmem:[#allocation7 + $0xa] sm:$0x3] %v150_v0  ;;  %v169_v8 = vadd.f32 %v168_v60, %v165_v1  ;;  %v180_v9 = vmul.f32 %v179_v5, %v156_v33  ;;  %v183_v10 = vstv %s598_s1  ;;  %v321_v11 = vadd.f32 %v320_v63, %v317_v3 }
  0x32   :  { %v184_v12 = vmul.f32 %v183_v10, %v158_v48  ;;  %304 = vst [vmem:[#allocation7 + $0x1a] sm:$0x3] %v302_v6  ;;  %v332_v13 = vmul.f32 %v308_v45, %v179_v5  ;;  %v336_v14 = vmul.f32 %v310_v51, %v183_v10  ;;  %v187_v18 = vstv %s601_s21 }
  0x33   :  { %v172_v15 = vadd.f32 %v171_v61, %v169_v8  ;;  %v181_v16 = vadd.f32 %v180_v9, %v177_v4  ;;  %v324_v17 = vadd.f32 %v321_v11, %v171_v61 }
  0x34   :  { %v333_v19 = vadd.f32 %v332_v13, %v329_v7 }
  0x35   :  { %174 = vst [vmem:[#allocation7 + $0xc] sm:$0x3] %v172_v15  ;;  %v185_v20 = vadd.f32 %v184_v12, %v181_v16 }
  0x36   :  { %326 = vst [vmem:[#allocation7 + $0x1c] sm:$0x3] %v324_v17  ;;  %v337_v21 = vadd.f32 %v336_v14, %v333_v19 }
  0x37   :  { %v188_v22 = vadd.f32 %v187_v18, %v185_v20 }
  0x38   :  { %v340_v23 = vadd.f32 %v337_v21, %v187_v18 }
  0x39   :  { %190 = vst [vmem:[#allocation7 + $0xe] sm:$0x3] %v188_v22 }
  0x3a   :  { %342 = vst [vmem:[#allocation7 + $0x1e] sm:$0x3] %v340_v23 }
  0x3b   :  { %355 = dma.vmem_to_hbm [thread:$0]  %s348_s23, 512, %s350_s26, [#allocation4], %s498_s18, %s498_s18, %s499_s19  }
  0x3c   :  { %494 = dma.done.wait [#allocation4], 512  }
  0x3d   :  { %495 = vsyncadd [#allocation4], 4294966784 }
  0x3e   :  { %360 = vsyncpa [#allocation3], 1 }
  0x3f   :  { %361 = vsyncpa [#allocation4], 1 }
  0x40   :  { %362 = vsyncpa [#allocation5], 1 }

</bundles_post_ra>
